<compile_context>
chip_gen: v5e
topology: v5e:2x2
jax: 0.10.0
libtpu: 0.0.40
codegen_flags: <defaults>
</compile_context>

<pallas_src>
import functools

import jax
import jax.numpy as jnp
from jax.experimental import pallas as pl
from jax.experimental.pallas import tpu as pltpu


def _round_up(x, m):
    return ((x + m - 1) // m) * m


def _pick_block(n_pad, cap):
    """Largest multiple of 128 that divides n_pad and is <= cap (min 128)."""
    b = max(128, (min(cap, n_pad) // 128) * 128)
    while n_pad % b:
        b -= 128
    return b


def _pick_n_pad(n):
    """Pad N to a multiple of 512/256 when the overhead is small, else 128."""
    for g in (512, 256):
        cand = _round_up(n, g)
        if cand - n <= n // 8:
            return cand
    return _round_up(n, 128)


def _vmem_limit(need_bytes):
    try:
        cap = int(pltpu.get_tpu_info().vmem_capacity_bytes)
    except Exception:
        cap = 64 << 20                       # v7x-safe fallback
    return int(min(max(need_bytes + (2 << 20), 32 << 20), cap - (8 << 20)))


# ---------------------------------------------------------------------------
# Kernel 1: single streaming pass over the raw adjacency.
#   outputs: D^{-1/2}  [N_pad, 1] f32   and   Â = A (+ I)  [N_pad, N_pad] bf16
# Partial edge tiles of the unpadded input are masked with iota (garbage-safe);
# the padded region of Â is written as exact zeros.
# ---------------------------------------------------------------------------
def degree_kernel(adj_ref, dinv_ref, adjp_ref, *, n_valid, bd, add_self_loops):
    r = pl.program_id(0)
    c = pl.program_id(1)

    a = adj_ref[...].astype(jnp.float32)
    rows = r * bd + jax.lax.broadcasted_iota(jnp.int32, a.shape, 0)
    cols = c * bd + jax.lax.broadcasted_iota(jnp.int32, a.shape, 1)
    valid = jnp.logical_and(rows < n_valid, cols < n_valid)
    a = jnp.where(valid, a, 0.0)
    if add_self_loops:
        a = a + jnp.where(jnp.logical_and(valid, rows == cols), 1.0, 0.0)

    adjp_ref[...] = a.astype(adjp_ref.dtype)          # bf16 Â tile (padded = 0)

    @pl.when(c == 0)
    def _():
        dinv_ref[...] = jnp.zeros_like(dinv_ref)

    dinv_ref[...] += jnp.sum(a, axis=1, keepdims=True)

    @pl.when(c == pl.num_programs(1) - 1)
    def _():
        deg = dinv_ref[...]
        dinv_ref[...] = jnp.where(deg > 0.0, jax.lax.rsqrt(deg),
                                  jnp.zeros_like(deg))


# ---------------------------------------------------------------------------
# Kernel 2: fused K-hop propagation + sigmoid gating + weighted combination.
# Grid = (K, row_bands, contraction_blocks); contraction iterates fastest.
#   z_k = D^{-1/2} h_k is kept pre-scaled in a bf16 VMEM ping-pong buffer.
#   mm  accumulates Â[r, :] @ z_k in f32;   h_{k+1} = D^{-1/2} mm.
#   acc accumulates sigmoid(<h_k, w> + b) * h_k in f32.
# ---------------------------------------------------------------------------
def dagnn_kernel(dinv_r_ref, dinv_c_ref, x_ref, adj_ref, w_ref, b_ref, out_ref,
                 cur_ref, acc_ref, mm_ref, *, bm, bc, n_pad):
    k = pl.program_id(0)
    r = pl.program_id(1)
    c = pl.program_id(2)
    nk = pl.num_programs(0)
    nc = pl.num_programs(2)

    r_off = pl.multiple_of(r * bm, bm)
    c_off = pl.multiple_of(c * bc, bc)
    slot = k % 2                                       # ping-pong slot for z_k
    read_base = pl.multiple_of(slot * n_pad + c_off, bc)
    write_base = pl.multiple_of((1 - slot) * n_pad + r_off, bm)

    w = w_ref[...]                                     # [1, F_pad] f32, hoisted
    b = b_ref[0]                                       # scalar from SMEM

    def gate(h):                                       # sigmoid(lin(h)), out_channels == 1
        return jax.nn.sigmoid(jnp.sum(h * w, axis=-1, keepdims=True) + b)

    # hop 0, first row band: stage z_0 = D^{-1/2} x (bf16 matmul RHS) and seed
    # the gated accumulator with the h_0 = x term (f32).
    @pl.when(jnp.logical_and(k == 0, r == 0))
    def _():
        x_c = x_ref[...]                                           # [bc, F_pad] f32
        cur_ref[pl.ds(read_base, bc), :] = (
            dinv_c_ref[...] * x_c).astype(cur_ref.dtype)
        acc_ref[pl.ds(c_off, bc), :] = gate(x_c) * x_c

    # streamed matmul:  mm += Â[r, c] @ z_k[c]   (bf16 x bf16 -> f32 on MXU)
    @pl.when(c == 0)
    def _():
        mm_ref[...] = jnp.zeros_like(mm_ref)

    mm_ref[...] += jnp.dot(adj_ref[...], cur_ref[pl.ds(read_base, bc), :],
                           preferred_element_type=jnp.float32)

    # last contraction block: finish h_{k+1}, gate + accumulate, stage z_{k+1},
    # and emit the output only on the final hop (single HBM writeback).
    @pl.when(c == nc - 1)
    def _():
        dinv_r = dinv_r_ref[...]                                   # [bm, 1] f32
        h_new = dinv_r * mm_ref[...]                               # h_{k+1}, f32
        acc_ref[pl.ds(r_off, bm), :] += gate(h_new) * h_new

        @pl.when(k < nk - 1)
        def _():
            cur_ref[pl.ds(write_base, bm), :] = (
                dinv_r * h_new).astype(cur_ref.dtype)              # z_{k+1}, bf16

        @pl.when(k == nk - 1)
        def _():
            out_ref[...] = acc_ref[pl.ds(r_off, bm), :].astype(out_ref.dtype)


# ---------------------------------------------------------------------------
# Wrapper
# ---------------------------------------------------------------------------
def dagnn_conv(x, adj, weight, bias, *, K, add_self_loops=True,
               block_rows=256, block_cols=1024):
    """Pallas implementation of DAGNNConv.forward for a dense adjacency."""
    N, F = x.shape
    assert adj.shape == (N, N)
    assert weight.shape == (1, F)
    assert bias.shape == (1,)
    assert K >= 1

    N_pad = _pick_n_pad(N)
    F_pad = _round_up(F, 128)                 # lane-dense feature dim
    bc = _pick_block(N_pad, block_cols)       # contraction block (>=256 when possible)
    bm = min(_pick_block(N_pad, block_rows), bc)   # output row band (<= bc)
    R_m, R_c = N_pad // bm, N_pad // bc

    # Zero padding preserves semantics: padded nodes are isolated (zero rows of
    # Â, dinv = 0) and padded feature columns have zero weight -> they stay zero
    # and are sliced off at the end.
    x_p = jnp.pad(x.astype(jnp.float32), ((0, N_pad - N), (0, F_pad - F)))
    w_p = jnp.pad(weight.astype(jnp.float32), ((0, 0), (0, F_pad - F)))
    b = bias.astype(jnp.float32)

    # ---- Kernel 1: raw adjacency -> D^{-1/2} + padded bf16 Â (fused pad/cast).
    if N >= 128:
        adj_src = adj                                      # unpadded, tiles masked
        bdeg = _pick_block(N_pad, min(bc, (N // 128) * 128))
    else:
        adj_src = jnp.pad(adj, ((0, N_pad - N), (0, N_pad - N)))
        bdeg = N_pad
    Rd = N_pad // bdeg
    adj_isz = jnp.dtype(adj.dtype).itemsize
    deg_need = 2 * bdeg * bdeg * adj_isz + 2 * bdeg * bdeg * 2 + 2 * bdeg * 512

    dinv, adj_p = pl.pallas_call(
        functools.partial(degree_kernel, n_valid=N, bd=bdeg,
                          add_self_loops=add_self_loops),
        grid=(Rd, Rd),
        out_shape=(jax.ShapeDtypeStruct((N_pad, 1), jnp.float32),
                   jax.ShapeDtypeStruct((N_pad, N_pad), jnp.bfloat16)),
        in_specs=[pl.BlockSpec((bdeg, bdeg), lambda r, c: (r, c))],
        out_specs=(pl.BlockSpec((bdeg, 1), lambda r, c: (r, 0)),
                   pl.BlockSpec((bdeg, bdeg), lambda r, c: (r, c))),
        compiler_params=pltpu.CompilerParams(
            dimension_semantics=("parallel", "arbitrary"),
            vmem_limit_bytes=_vmem_limit(deg_need)),
        cost_estimate=pl.CostEstimate(
            flops=int(N_pad * N_pad),
            transcendentals=int(N_pad),
            bytes_accessed=int(N * N * adj_isz + N_pad * N_pad * 2 + N_pad * 4)),
    )(adj_src)

    # ---- Kernel 2: fused K-hop propagation + gating + weighted sum ----------
    x_isz = jnp.dtype(x.dtype).itemsize
    adj_bufs = 3
    need = (2 * N_pad * F_pad * 2          # z_k ping-pong (bf16)
            + N_pad * F_pad * 4            # gated accumulator (f32)
            + bm * F_pad * 4               # per-row-band matmul accumulator
            + adj_bufs * bm * bc * 2       # adjacency stream buffers
            + 2 * bc * F_pad * 4           # x blocks
            + 2 * bm * F_pad * x_isz       # out blocks
            + 2 * (bm + bc) * 512          # dinv blocks (lane padded)
            + 2 * F_pad * 4)               # lin weight

    adj_index = lambda k, r, c: (r, c)
    adj_spec = pl.BlockSpec((bm, bc), adj_index)
    if hasattr(pl, "Buffered"):
        try:  # deeper pipelining on the adjacency stream hides the finalize bubble
            adj_spec = pl.BlockSpec((bm, bc), adj_index,
                                    pipeline_mode=pl.Buffered(adj_bufs))
        except TypeError:
            pass

    first_band = lambda k, r: jnp.logical_and(k == 0, r == 0)
    # x / dinv_c are only consumed at (k==0, r==0); freeze their block index
    # elsewhere so Pallas does not keep re-fetching them from HBM.
    x_map = lambda k, r, c: (jnp.where(first_band(k, r), c, 0), 0)
    dinv_c_map = lambda k, r, c: (jnp.where(first_band(k, r), c, 0), 0)
    # Route earlier hops' output block to a sacrificial padded row block so the
    # real output rows are written back to HBM exactly once (at k == K-1).
    out_map = lambda k, r, c: (jnp.where(k == K - 1, r, R_m), 0)

    out_p = pl.pallas_call(
        functools.partial(dagnn_kernel, bm=bm, bc=bc, n_pad=N_pad),
        grid=(K, R_m, R_c),
        out_shape=jax.ShapeDtypeStruct((N_pad + bm, F_pad), x.dtype),
        in_specs=[
            pl.BlockSpec((bm, 1), lambda k, r, c: (r, 0)),    # D^-1/2 (row band)
            pl.BlockSpec((bc, 1), dinv_c_map),                # D^-1/2 (staging)
            pl.BlockSpec((bc, F_pad), x_map),                 # x (staged once)
            adj_spec,                                         # bf16 Â tile stream
            pl.BlockSpec((1, F_pad), lambda k, r, c: (0, 0)), # lin weight
            pl.BlockSpec(memory_space=pltpu.SMEM),            # lin bias (scalar)
        ],
        out_specs=pl.BlockSpec((bm, F_pad), out_map),
        scratch_shapes=[
            pltpu.VMEM((2 * N_pad, F_pad), jnp.bfloat16),     # z_k ping-pong
            pltpu.VMEM((N_pad, F_pad), jnp.float32),          # gated accumulator
            pltpu.VMEM((bm, F_pad), jnp.float32),             # matmul accumulator
        ],
        compiler_params=pltpu.CompilerParams(
            dimension_semantics=("arbitrary", "arbitrary", "arbitrary"),
            vmem_limit_bytes=_vmem_limit(need)),
        cost_estimate=pl.CostEstimate(
            flops=int(2 * K * N_pad * N_pad * F_pad),
            transcendentals=int((K + 1) * N_pad),
            bytes_accessed=int(K * N_pad * N_pad * 2 + 3 * N_pad * F_pad * 4)),
    )(dinv, dinv, x_p, adj_p, w_p, b)

    return out_p[:N, :F]


# ---------------------------------------------------------------------------
# Pure-JAX reference mirroring the PyTorch module.
# ---------------------------------------------------------------------------
def dagnn_conv_reference(x, adj, weight, bias, *, K):
    N = x.shape[0]
    a = adj + jnp.eye(N, dtype=adj.dtype)
    deg = a.sum(axis=1)
    dinv = jnp.where(deg > 0, deg ** -0.5, 0.0)
    adj_n = dinv[:, None] * a * dinv[None, :]
    xs = [x]
    h = x
    for _ in range(K):
        h = adj_n @ h
        xs.append(h)
    H = jnp.stack(xs, axis=1)                          # [N, K+1, F]
    S = jax.nn.sigmoid(H @ weight.T + bias)            # [N, K+1, 1]
    S = jnp.transpose(S, (0, 2, 1))                    # [N, 1, K+1]
    return jnp.squeeze(S @ H, axis=1)                  # [N, F]


if __name__ == "__main__":
    N, F, K = 200, 48, 3                               # exercises padding + masked edge tiles

    key = jax.random.PRNGKey(0)
    k_adj, k_x, k_w = jax.random.split(key, 3)

    # Deterministic symmetric binary adjacency (no self loops; kernel adds them).
    a = (jax.random.uniform(k_adj, (N, N)) < 0.05).astype(jnp.float32)
    adj = jnp.maximum(a, a.T) * (1.0 - jnp.eye(N, dtype=jnp.float32))

    x = jax.random.normal(k_x, (N, F), dtype=jnp.float32)

    # Glorot-uniform init for lin.weight [out=1, in=F]; zero bias.
    limit = (6.0 / (F + 1)) ** 0.5
    weight = jax.random.uniform(k_w, (1, F), minval=-limit, maxval=limit,
                                dtype=jnp.float32)
    bias = jnp.zeros((1,), dtype=jnp.float32)

    out = dagnn_conv(x, adj, weight, bias, K=K)
    out = jax.block_until_ready(out)

    ref = dagnn_conv_reference(x, adj, weight, bias, K=K)
    assert out.shape == (N, F)
    max_err = jnp.max(jnp.abs(out - ref))
    # The adjacency and the propagated features are streamed in bf16 (f32
    # accumulation), so compare against the f32 reference with a bf16-aware
    # tolerance.
    assert jnp.allclose(out, ref, atol=2e-2, rtol=2e-2), (
        f"mismatch vs reference, max abs err = {max_err}")

    print("KERNEL_OK")
</pallas_src>

<mosaic_0001>
module attributes {stable_mosaic.version = 11 : i64} {
  func.func @degree_kernel(%arg0: i32, %arg1: i32, %arg2: memref<128x128xf32, #tpu.memory_space<vmem>>, %arg3: memref<128x1xf32, #tpu.memory_space<vmem>>, %arg4: memref<128x128xbf16, #tpu.memory_space<vmem>>) attributes {dimension_semantics = [#tpu.dimension_semantics<parallel>, #tpu.dimension_semantics<arbitrary>], iteration_bounds = array<i64: 2, 2>, scalar_prefetch = 0 : i64, scratch_operands = 0 : i64, tpu.core_type = #tpu.core_type<tc>, window_params = [{transform_indices = @transform_0, window_bounds = array<i64: 128, 128>}, {transform_indices = @transform_1, window_bounds = array<i64: 128, 1>}, {transform_indices = @transform_2, window_bounds = array<i64: 128, 128>}]} {
    %c0 = arith.constant 0 : index
    %c0_0 = arith.constant 0 : index
    %0 = vector.load %arg2[%c0, %c0_0] : memref<128x128xf32, #tpu.memory_space<vmem>>, vector<128x128xf32>
    %c128_i32 = arith.constant 128 : i32
    %1 = arith.muli %arg0, %c128_i32 : i32
    %2 = tpu.iota {dimensions = array<i32: 0>} : vector<128x128xi32>
    %3 = vector.broadcast %1 : i32 to vector<128x128xi32>
    %4 = arith.addi %3, %2 : vector<128x128xi32>
    %c128_i32_1 = arith.constant 128 : i32
    %5 = arith.muli %arg1, %c128_i32_1 : i32
    %6 = tpu.iota {dimensions = array<i32: 1>} : vector<128x128xi32>
    %7 = vector.broadcast %5 : i32 to vector<128x128xi32>
    %8 = arith.addi %7, %6 : vector<128x128xi32>
    %c200_i32 = arith.constant 200 : i32
    %9 = vector.broadcast %c200_i32 : i32 to vector<128x128xi32>
    %10 = arith.cmpi slt, %4, %9 : vector<128x128xi32>
    %c200_i32_2 = arith.constant 200 : i32
    %11 = vector.broadcast %c200_i32_2 : i32 to vector<128x128xi32>
    %12 = arith.cmpi slt, %8, %11 : vector<128x128xi32>
    %13 = arith.andi %10, %12 : vector<128x128xi1>
    %cst = arith.constant 0.000000e+00 : f32
    %14 = vector.broadcast %cst : f32 to vector<128x128xf32>
    %15 = arith.select %13, %0, %14 : vector<128x128xi1>, vector<128x128xf32>
    %16 = arith.cmpi eq, %4, %8 : vector<128x128xi32>
    %17 = arith.andi %13, %16 : vector<128x128xi1>
    %cst_3 = arith.constant 1.000000e+00 : f32
    %cst_4 = arith.constant 0.000000e+00 : f32
    %18 = vector.broadcast %cst_3 : f32 to vector<128x128xf32>
    %19 = vector.broadcast %cst_4 : f32 to vector<128x128xf32>
    %20 = arith.select %17, %18, %19 : vector<128x128xi1>, vector<128x128xf32>
    %21 = arith.addf %15, %20 : vector<128x128xf32>
    %22 = arith.truncf %21 : vector<128x128xf32> to vector<128x128xbf16>
    %c0_5 = arith.constant 0 : index
    %c0_6 = arith.constant 0 : index
    %23 = vector.load %arg4[%c0_5, %c0_6] : memref<128x128xbf16, #tpu.memory_space<vmem>>, vector<128x128xbf16>
    tpu.vector_store %arg4[%c0_5, %c0_6], %22 {strides = array<i32>} : memref<128x128xbf16, #tpu.memory_space<vmem>>, vector<128x128xbf16>,
    %c0_i32 = arith.constant 0 : i32
    %24 = arith.cmpi eq, %arg1, %c0_i32 : i32
    %25 = arith.extui %24 : i1 to i32
    %c0_i32_7 = arith.constant 0 : i32
    %26 = arith.cmpi ne, %25, %c0_i32_7 : i32
    scf.if %26 {
      %cst_14 = arith.constant 0.000000e+00 : f32
      %35 = vector.broadcast %cst_14 : f32 to vector<128x1xf32>
      %c0_15 = arith.constant 0 : index
      %c0_16 = arith.constant 0 : index
      %36 = vector.load %arg3[%c0_15, %c0_16] : memref<128x1xf32, #tpu.memory_space<vmem>>, vector<128x1xf32>
      tpu.vector_store %arg3[%c0_15, %c0_16], %35 {strides = array<i32>} : memref<128x1xf32, #tpu.memory_space<vmem>>, vector<128x1xf32>,
    } else {
    }
    %c0_8 = arith.constant 0 : index
    %c0_9 = arith.constant 0 : index
    %27 = vector.load %arg3[%c0_8, %c0_9] : memref<128x1xf32, #tpu.memory_space<vmem>>, vector<128x1xf32>
    %cst_10 = arith.constant dense<0.000000e+00> : vector<128xf32>
    %28 = vector.multi_reduction <add>, %21, %cst_10 [1] : vector<128x128xf32> to vector<128xf32>
    %29 = vector.shape_cast %28 : vector<128xf32> to vector<128x1xf32>
    %30 = arith.addf %27, %29 : vector<128x1xf32>
    %c0_11 = arith.constant 0 : index
    %c0_12 = arith.constant 0 : index
    %31 = vector.load %arg3[%c0_11, %c0_12] : memref<128x1xf32, #tpu.memory_space<vmem>>, vector<128x1xf32>
    tpu.vector_store %arg3[%c0_11, %c0_12], %30 {strides = array<i32>} : memref<128x1xf32, #tpu.memory_space<vmem>>, vector<128x1xf32>,
    %c1_i32 = arith.constant 1 : i32
    %32 = arith.cmpi eq, %arg1, %c1_i32 : i32
    %33 = arith.extui %32 : i1 to i32
    %c0_i32_13 = arith.constant 0 : i32
    %34 = arith.cmpi ne, %33, %c0_i32_13 : i32
    scf.if %34 {
      %c0_14 = arith.constant 0 : index
      %c0_15 = arith.constant 0 : index
      %35 = vector.load %arg3[%c0_14, %c0_15] : memref<128x1xf32, #tpu.memory_space<vmem>>, vector<128x1xf32>
      %cst_16 = arith.constant 0.000000e+00 : f32
      %36 = vector.broadcast %cst_16 : f32 to vector<128x1xf32>
      %37 = arith.cmpf ogt, %35, %36 : vector<128x1xf32>
      %38 = math.rsqrt %35 : vector<128x1xf32>
      %cst_17 = arith.constant 0.000000e+00 : f32
      %39 = vector.broadcast %cst_17 : f32 to vector<128x1xf32>
      %40 = arith.select %37, %38, %39 : vector<128x1xi1>, vector<128x1xf32>
      %c0_18 = arith.constant 0 : index
      %c0_19 = arith.constant 0 : index
      %41 = vector.load %arg3[%c0_18, %c0_19] : memref<128x1xf32, #tpu.memory_space<vmem>>, vector<128x1xf32>
      tpu.vector_store %arg3[%c0_18, %c0_19], %40 {strides = array<i32>} : memref<128x1xf32, #tpu.memory_space<vmem>>, vector<128x1xf32>,
    } else {
    }
    return
  }
  func.func @transform_0(%arg0: i32, %arg1: i32) -> (i32, i32) {
    %c0_i32 = arith.constant 0 : i32
    return %arg0, %arg1 : i32, i32
  }
  func.func @transform_1(%arg0: i32, %arg1: i32) -> (i32, i32) {
    %c0_i32 = arith.constant 0 : i32
    %c0_i32_0 = arith.constant 0 : i32
    return %arg0, %c0_i32 : i32, i32
  }
  func.func @transform_2(%arg0: i32, %arg1: i32) -> (i32, i32) {
    %c0_i32 = arith.constant 0 : i32
    return %arg0, %arg1 : i32, i32
  }
}

</mosaic_0001>

<bundles_post_ra>
// kernel: tpu_custom_call.1
= control target key start
LH: loop header
LB: loop body
LE: loop exit
PB: predicated region body
PF: predicated region fallthrough
CT: control target
= control target key end

     0   :  { %8 = vsyncpa [#allocation3], 0  ;;  %s2157_s0 = inlined_call_operand.hbm [shape: f32[200,200], index: 0, kind: input, shape index: {}]   ;;  %s2158_s1 = inlined_call_operand.vmem [shape: f32[256,1], index: 1, kind: output, shape index: {0}]   ;;  %s2159_s2 = inlined_call_operand.hbm [shape: bf16[256,256], index: 2, kind: output, shape index: {1}]  }
   0x1   :  { %10 = vsyncpa [#allocation3 + $0x1], 0 }
   0x2   :  { %11 = vsyncpa [#allocation4], 0 }
   0x3   :  { %13 = vsyncpa [#allocation4 + $0x1], 0  ;;  %s1231_s9 = smov 0   ;;  %s1233_s10 = smov 0  }
   0x4   :  { %s1235_s11 = smov 0   ;;  %s1237_s12 = smov 0  }
   0x5   :  { %s1239_s13 = smov 0   ;;  %s1241_s14 = smov 0  }
   0x6   :  { %s1243_s15 = smov 0   ;;  %s1245_s16 = smov 0  }
   0x7 LB: > { %2163 = sst [smem:[#allocation8_spill]] %s1201_s15  ;;  %s880_s17 = sadd.s32 4294967295, %s1205_s16   ;;  %s1205_s16 = sphi %s1245_s16, %s19_s16   ;;  %s1201_s15 = sphi %s1243_s15, %s2237_s15   ;;  %s1197_s14 = sphi %s1241_s14, %s2242_s14   ;;  %s1193_s13 = sphi %s1239_s13, %s2235_s13   ;;  %s1189_s12 = sphi %s1237_s12, %s2241_s12   ;;  %s1185_s11 = sphi %s1235_s11, %s2240_s11   ;;  %s1181_s10 = sphi %s1233_s10, %s2239_s10   ;;  %s1177_s9 = sphi %s1231_s9, %s2238_s9  }
   0x8   : > { %s881_s18 = sadd.s32 4294967294, %s1205_s16   ;;  %s28_s19 = sadd.s32 1, %s1197_s14 }
   0x9   : > { %p29_p0 = scmp.ge.s32.totalorder %s28_s19, 2  ;;  %s31_s20 = sadd.s32 1, %s1201_s15 }
   0xa   : > { %p47_p1 = scmp.ne.s32.totalorder %s1185_s11, %s1181_s10  ;;  %p48_p2 = scmp.eq.s32.totalorder %s1205_s16, 0 }
   0xb   : > { %s2244_s19 = smov (%p29_p0, %s28_s19), 0  ;;  %s2246_s20 = smov (!%p29_p0, %s31_s20), %s1201_s15 }
   0xc   : > { %2164 = sst [smem:[#allocation9_spill]] %s2244_s19  ;;  %s36_s21 = ssub.s32 %s1197_s14, %s2244_s19 }
   0xd   : > { %p1283_p3 = por %p48_p2, %p47_p1  ;;  %p33_p4 = scmp.ge.s32.totalorder %s2246_s20, 2 }
   0xe   : > { %p53_p5 = scmp.ne.s32.totalorder %s1181_s10, %s1177_s9  ;;  %p54_p6 = scmp.eq.s32.totalorder %s880_s17, 0 }
   0xf   : > { %p105_p7 = scmp.eq.s32.totalorder %s880_s17, 3  ;;  %s2248_s20 = smov (%p33_p4, %s2246_s20), 0 }
  0x10   : > { %2166 = sst [smem:[#allocation10_spill]] %s2248_s20  ;;  %p1291_p8 = por %p54_p6, %p53_p5 }
  0x11   : > { %p1295_p9 = por %p105_p7, %p47_p1  ;;  %s35_s25 = ssub.s32 %s1201_s15, %s2248_s20 }
  0x12   : > { %p111_p10 = scmp.eq.s32.totalorder %s881_s18, 3  ;;  %s37_s26 = sor.u32 %s36_s21, %s35_s25 }
  0x13   : > { %s40_s27 = sadd.s32 1, %s1185_s11  ;;  %p38_p11 = scmp.eq.s32.totalorder %s37_s26, 0 }
  0x14   : > { %p1302_p12 = por %p111_p10, %p53_p5  ;;  %p883_p13 = scmp.ge.s32.totalorder %s1205_s16, 4 }
  0x15   : > { %s1307_s29 = scalar_select %p38_p11, %s1185_s11, %s40_s27  }
  0x16   : > { %127 = sbr.rel (%p883_p13) target bundleno = 54 (0x36), region = 16 }
  0x1b   : > { %130 = sbr.rel (!%p1283_p3) target bundleno = 54 (0x36), region = 20  ;;  %s131_s30 = sand.u32 (%p1283_p3), 1, %s1185_s11  }
  0x1c   : > { %s885_s3 = sshll.u32 (%p1283_p3), %s1201_s15, 4  ;;  %s884_s4 = sshll.u32 (%p1283_p3), %s131_s30, 7 }
  0x1d   : > { %s137_s5 = ssub.s32 (%p1283_p3), 25, %s885_s3  ;;  %s1317_s17 = scalar_lea.sflag (%p1283_p3), [#allocation3], %s131_s30 }
  0x1e   : > { %p138_p0 = scmp.lt.s32.totalorder (%p1283_p3), %s137_s5, 16  ;;  %s135_s18 = scalar_lea.vmem (%p1283_p3), [#allocation2], %s884_s4 }
  0x20   : > { %s2250_s5 = smov (!%p138_p0, %s137_s5), 16 }
  0x21   : > { %s886_s6 = sshll.u32 %s2250_s5, 3 }
  0x22   : > { %s141_s7 = ssub.s32 128, %s886_s6 }
  0x23   : > { %s142_s8 = sshll.u32 %s141_s7, 4 }
  0x24   : > { %143 = vsyncadd %s1317_s17, %s142_s8  ;;  %p1320_p1 = scmp.ne.s32.totalorder %s886_s6, 0  ;;  %s907_s22 = sshll.u32 %s1201_s15, 5 }
  0x25   : > { %s146_s25 = sadd.s32 %s1197_s14, %s907_s22  ;;  %s152_s26 = sshll.u32 %s135_s18, 4  ;;  %s153_s26 = int_to_ptr.vmem [resolvable:$true] %s152_s26 }
  0x26   : > { %s889_s27 = sshll.u32 %s146_s25, 3  ;;  %s891_s20 = sshll.u32 %s2250_s5, 7 }
  0x27   : > { %s148_s30 = scalar_lea.hbm %s2157_s0, %s889_s27  ;;  %s1070_s8 = sshrl.u32 %s891_s20, 4 }
  0x28   : > { %s150_s4 = sshll.u32 %s148_s30, 4  ;;  %s1087_s19 = sshra.s32 %s153_s26, 4  ;;  %s151_s4 = int_to_ptr.hbm [resolvable:$true] %s150_s4  ;;  %s1088_s19 = int_to_ptr.vmem [resolvable:$true] %s1087_s19 }
  0x29   : > { %s1094_s6 = scalar_lea.vmem %s1088_s19, %s1070_s8  ;;  %s1207_s15 = smov [#allocation2]  }
  0x2a   : > { %p1095_p2 = scmp.ne.s32.totalorder %s1088_s19, %s1094_s6  ;;  %s1098_s22 = scalar_lea.vmem %s1207_s15, 256 }
  0x2b   : > { %p1100_p5 = scmp.lt.s32.totalorder %s1098_s22, %s1094_s6 }
  0x2c   : > { %p1096_p3 = pnand %p1095_p2, %p1320_p1 }
  0x2e   : > { %p1097_p4 = pneg %p1096_p3 }
  0x30   : > { %p1102_p6 = pnand %p1100_p5, %p1097_p4 }
  0x32   : > { %1105 = shalt.err (!%p1102_p6)
}
  0x33   : > { %s1208_s18 = smov 256   ;;  %s1209_s25 = smov 128  }
  0x34   : > { %s1210_s5 = smov 8  }
  0x35   : > { %158 = dma.hbm_to_vmem [thread:$0]  (%p1320_p1), %s151_s4, %s891_s20, %s153_s26, %s1317_s17, %s1208_s18, %s1209_s25, %s1210_s5  }
  0x36 PF: > { %p892_p7 = scmp.ge.s32.totalorder %s1205_s16, 1  ;;  %p160_p10 = scmp.lt.s32.totalorder %s1205_s16, 5 }
  0x38   : > { %p161_p11 = pnand %p892_p7, %p160_p10 }
  0x39   : > { %s1338_s15 = sand.u32 (!%p161_p11), 1, %s1181_s10  }
  0x3a   : > { %164 = sbr.rel (%p161_p11) target bundleno = 357 (0x165), region = 24  ;;  %s893_s19 = sshll.u32 (!%p161_p11), %s1338_s15, 7 }
  0x3b   : > { %s167_s27 = scalar_lea.sflag (!%p161_p11), [#allocation3], %s1338_s15  ;;  %s1342_s3 = scalar_lea.vmem (!%p161_p11), [#allocation2], %s893_s19 }
  0x3f   : > { %1168 = dma.done.wait (%p1291_p8), %s167_s27, 2048  }
  0x40   : > { %1170 = vsyncadd (%p1291_p8), %s167_s27, 4294965248  ;;  %s895_s20 = sshll.u32 %s1193_s13, 4  ;;  %v226_v0 = vlaneseq  ;;  %s897_s17 = sshll.u32 %s1193_s13, 7  ;;  %v209_v13 = vld [vmem:[%s1342_s3] sm:$0xff]  ;;  %v210_v14 = vld [vmem:[%s1342_s3 + $0x8] sm:$0xff]  ;;  %v1211_v23 = vmov 0.0  }
  0x41   : > { %p203_p13 = scmp.lt.s32.totalorder %s895_s20, 31  ;;  %s898_s21 = sshll.u32 %s1189_s12, 7  ;;  %v1353_v3 = vstv %s897_s17  ;;  %v211_v25 = vld [vmem:[%s1342_s3 + $0x10] sm:$0xff]  ;;  %v212_v29 = vld [vmem:[%s1342_s3 + $0x18] sm:$0xff]  ;;  %v213_v37 = vld [vmem:[%s1342_s3 + $0x20] sm:$0xff] }
  0x42   : > { %v1350_v1 = vshrl.u32 %v226_v0, 7  ;;  %v262_v2 = vand.u32 127, %v226_v0  ;;  %v263_v4 = vstv %s898_s21  ;;  %s894_s4 = sshll.u32 %s1338_s15, 6  ;;  %v214_v43 = vld [vmem:[%s1342_s3 + $0x28] sm:$0xff]  ;;  %v215_v53 = vld [vmem:[%s1342_s3 + $0x30] sm:$0xff]  ;;  %v216_v58 = vld [vmem:[%s1342_s3 + $0x38] sm:$0xff] }
  0x43   : > { %s2252_s20 = smov (!%p203_p13, %s895_s20), 31  ;;  %s1456_s8 = scalar_lea.vmem [#allocation5], %s894_s4  ;;  %v219_v22 = vld [vmem:[%s1342_s3 + $0x50] sm:$0xff] }
  0x44   : > { %v228_v5 = vadd.s32 8, %v1350_v1  ;;  %v244_v6 = vadd.s32 %v1353_v3, %v1350_v1  ;;  %v1358_v7 = vadd.s32 %v263_v4, %v262_v2  ;;  %v229_v8 = vadd.s32 16, %v1350_v1  ;;  %s896_s23 = sshll.u32 %s2252_s20, 3  ;;  %p899_p8 = scmp.ne.s32.totalorder %s1189_s12, 0 }
  0x45   : > { %v230_v9 = vadd.s32 24, %v1350_v1  ;;  %v231_v10 = vadd.s32 32, %v1350_v1  ;;  %v232_v11 = vadd.s32 40, %v1350_v1  ;;  %s1367_s30 = scalar_lea.vmem %s2158_s1, %s896_s23  ;;  %v233_v19 = vadd.s32 48, %v1350_v1 }
  0x46   : > { %v245_v12 = vadd.s32 %v1353_v3, %v228_v5  ;;  %vm265_vm0 = vcmp.lt.s32.totalorder %v244_v6, 200  ;;  %vm281_vm1 = vcmp.lt.s32.totalorder %v1358_v7, 200  ;;  %vm314_vm2 = vcmp.eq.s32.totalorder %v244_v6, %v1358_v7  ;;  %v217_v6 = vld [vmem:[%s1342_s3 + $0x40] sm:$0xff] }
  0x47   : > { %vm1376_vm3 = vmand %vm265_vm0, %vm281_vm1  ;;  %v246_v16 = vadd.s32 %v1353_v3, %v229_v8  ;;  %v247_v17 = vadd.s32 %v1353_v3, %v230_v9  ;;  %v248_v18 = vadd.s32 %v1353_v3, %v231_v10  ;;  %v249_v21 = vadd.s32 %v1353_v3, %v232_v11 }
  0x48   : > { %vm266_vm4 = vcmp.lt.s32.totalorder %v245_v12, 200  ;;  %v298_v20 = vsel %vm1376_vm3, %v209_v13, 0.0  ;;  %vm315_vm5 = vcmp.eq.s32.totalorder %v245_v12, %v1358_v7  ;;  %vm330_vm6 = vmand %vm1376_vm3, %vm314_vm2  ;;  %v234_v26 = vadd.s32 56, %v1350_v1  ;;  %v218_v12 = vld [vmem:[%s1342_s3 + $0x48] sm:$0xff] }
  0x49   : > { %vm1392_vm7 = vmand %vm266_vm4, %vm281_vm1  ;;  %v346_v24 = vsel %vm330_vm6, 1.0, %v1211_v23  ;;  %vm267_vm8 = vcmp.lt.s32.totalorder %v246_v16, 200  ;;  %vm268_vm9 = vcmp.lt.s32.totalorder %v247_v17, 200  ;;  %vm316_vm11 = vcmp.eq.s32.totalorder %v246_v16, %v1358_v7 }
  0x4a   : > { %v299_v27 = vsel %vm1392_vm7, %v210_v14, 0.0  ;;  %vm331_vm10 = vmand %vm1392_vm7, %vm315_vm5  ;;  %v1404_v28 = vadd.f32 %v346_v24, %v298_v20  ;;  %vm317_vm13 = vcmp.eq.s32.totalorder %v247_v17, %v1358_v7  ;;  %vm269_vm14 = vcmp.lt.s32.totalorder %v248_v18, 200 }
  0x4b   : > { %v347_v30 = vsel %vm331_vm10, 1.0, %v1211_v23  ;;  %vm1411_vm12 = vmand %vm267_vm8, %vm281_vm1  ;;  %vm270_vm0 = vcmp.lt.s32.totalorder %v249_v21, 200  ;;  %v250_v35 = vadd.s32 %v1353_v3, %v233_v19  ;;  %v251_v38 = vadd.s32 %v1353_v3, %v234_v26 }
  0x4c   : > { %v1416_v32 = vadd.f32 %v347_v30, %v299_v27  ;;  %vm1420_vm15 = vmand %vm268_vm9, %vm281_vm1  ;;  %v300_v34 = vsel %vm1411_vm12, %v211_v25, 0.0  ;;  %v235_v39 = vadd.s32 64, %v1350_v1  ;;  %v236_v40 = vadd.s32 72, %v1350_v1 }
  0x4d   : > { %v301_v36 = vsel %vm1420_vm15, %v212_v29, 0.0  ;;  %vm332_vm2 = vmand %vm1411_vm12, %vm316_vm11  ;;  %vm318_vm4 = vcmp.eq.s32.totalorder %v248_v18, %v1358_v7  ;;  %vm319_vm6 = vcmp.eq.s32.totalorder %v249_v21, %v1358_v7  ;;  %v237_v47 = vadd.s32 80, %v1350_v1  ;;  %v220_v29 = vld [vmem:[%s1342_s3 + $0x58] sm:$0xff] }
  0x4e   : > { %v912_v41 = vpack.c.bf16 %v1416_v32, %v1404_v28  ;;  %vm333_vm3 = vmand %vm1420_vm15, %vm317_vm13  ;;  %v348_v42 = vsel %vm332_vm2, 1.0, %v1211_v23  ;;  %vm271_vm8 = vcmp.lt.s32.totalorder %v250_v35, 200  ;;  %v252_v51 = vadd.s32 %v1353_v3, %v235_v39 }
  0x4f   : > { %v349_v44 = vsel %vm333_vm3, 1.0, %v1211_v23  ;;  %v1443_v45 = vadd.f32 %v348_v42, %v300_v34  ;;  %vm1448_vm5 = vmand %vm269_vm14, %vm281_vm1  ;;  %vm272_vm10 = vcmp.lt.s32.totalorder %v251_v38, 200  ;;  %v253_v54 = vadd.s32 %v1353_v3, %v236_v40  ;;  %v222_v42 = vld [vmem:[%s1342_s3 + $0x68] sm:$0xff] }
  0x50   : > { %913 = vst [vmem:[%s1456_s8] sm:$0xff] %v912_v41   ;;  %v1459_v48 = vadd.f32 %v349_v44, %v301_v36  ;;  %vm1464_vm7 = vmand %vm270_vm0, %vm281_vm1  ;;  %v302_v50 = vsel %vm1448_vm5, %v213_v37, 0.0  ;;  %v238_v55 = vadd.s32 88, %v1350_v1  ;;  %vm320_vm12 = vcmp.eq.s32.totalorder %v250_v35, %v1358_v7 }
  0x51   : > { %v303_v52 = vsel %vm1464_vm7, %v214_v43, 0.0  ;;  %vm334_vm9 = vmand %vm1448_vm5, %vm318_vm4  ;;  %vm321_vm14 = vcmp.eq.s32.totalorder %v251_v38, %v1358_v7  ;;  %v254_v62 = vadd.s32 %v1353_v3, %v237_v47  ;;  %vm273_vm0 = vcmp.lt.s32.totalorder %v252_v51, 200  ;;  %v221_v38 = vld [vmem:[%s1342_s3 + $0x60] sm:$0xff] }
  0x52   : > { %v917_v56 = vpack.c.bf16 %v1459_v48, %v1443_v45  ;;  %vm335_vm11 = vmand %vm1464_vm7, %vm319_vm6  ;;  %v350_v57 = vsel %vm334_vm9, 1.0, %v1211_v23  ;;  %v239_v4 = vadd.s32 96, %v1350_v1  ;;  %vm274_vm3 = vcmp.lt.s32.totalorder %v253_v54, 200 }
  0x53   : > { %v351_v59 = vsel %vm335_vm11, 1.0, %v1211_v23  ;;  %v1488_v60 = vadd.f32 %v350_v57, %v302_v50  ;;  %vm1493_vm13 = vmand %vm271_vm8, %vm281_vm1  ;;  %v255_v8 = vadd.s32 %v1353_v3, %v238_v55  ;;  %v240_v9 = vadd.s32 104, %v1350_v1 }
  0x54   : > { %949 = vst [vmem:[%s1456_s8 + $0x8] sm:$0xff] %v917_v56   ;;  %v1500_v63 = vadd.f32 %v351_v59, %v303_v52  ;;  %vm1505_vm15 = vmand %vm272_vm10, %vm281_vm1  ;;  %v304_v2 = vsel %vm1493_vm13, %v215_v53, 0.0  ;;  %vm322_vm5 = vcmp.eq.s32.totalorder %v252_v51, %v1358_v7  ;;  %vm323_vm7 = vcmp.eq.s32.totalorder %v253_v54, %v1358_v7  ;;  %v223_v51 = vld [vmem:[%s1342_s3 + $0x70] sm:$0xff]  ;;  %v224_v54 = vld [vmem:[%s1342_s3 + $0x78] sm:$0xff] }
  0x55   : > { %v305_v5 = vsel %vm1505_vm15, %v216_v58, 0.0  ;;  %vm336_vm2 = vmand %vm1493_vm13, %vm320_vm12  ;;  %vm275_vm8 = vcmp.lt.s32.totalorder %v254_v62, 200  ;;  %v256_v19 = vadd.s32 %v1353_v3, %v239_v4  ;;  %v241_v20 = vadd.s32 112, %v1350_v1 }
  0x56   : > { %v922_v10 = vpack.c.bf16 %v1500_v63, %v1488_v60  ;;  %vm337_vm4 = vmand %vm1505_vm15, %vm321_vm14  ;;  %v352_v11 = vsel %vm336_vm2, 1.0, %v1211_v23  ;;  %vm276_vm11 = vcmp.lt.s32.totalorder %v255_v8, 200  ;;  %v257_v24 = vadd.s32 %v1353_v3, %v240_v9 }
  0x57   : > { %v353_v13 = vsel %vm337_vm4, 1.0, %v1211_v23  ;;  %v1529_v14 = vadd.f32 %v352_v11, %v304_v2  ;;  %vm1534_vm6 = vmand %vm273_vm0, %vm281_vm1  ;;  %v242_v25 = vadd.s32 120, %v1350_v1  ;;  %vm324_vm13 = vcmp.eq.s32.totalorder %v254_v62, %v1358_v7 }
  0x58   : > { %950 = vst [vmem:[%s1456_s8 + $0x10] sm:$0xff] %v922_v10   ;;  %v1540_v16 = vadd.f32 %v353_v13, %v305_v5  ;;  %vm1545_vm9 = vmand %vm274_vm3, %vm281_vm1  ;;  %v306_v18 = vsel %vm1534_vm6, %v217_v6, 0.0  ;;  %vm325_vm15 = vcmp.eq.s32.totalorder %v255_v8, %v1358_v7  ;;  %vm277_vm2 = vcmp.lt.s32.totalorder %v256_v19, 200 }
  0x59   : > { %v307_v21 = vsel %vm1545_vm9, %v218_v12, 0.0  ;;  %vm338_vm10 = vmand %vm1534_vm6, %vm322_vm5  ;;  %v258_v36 = vadd.s32 %v1353_v3, %v241_v20  ;;  %vm278_vm4 = vcmp.lt.s32.totalorder %v257_v24, 200  ;;  %v259_v39 = vadd.s32 %v1353_v3, %v242_v25 }
  0x5a   : > { %v927_v26 = vpack.c.bf16 %v1540_v16, %v1529_v14  ;;  %vm339_vm12 = vmand %vm1545_vm9, %vm323_vm7  ;;  %v354_v27 = vsel %vm338_vm10, 1.0, %v1211_v23  ;;  %vm326_vm6 = vcmp.eq.s32.totalorder %v256_v19, %v1358_v7 }
  0x5b   : > { %v355_v30 = vsel %vm339_vm12, 1.0, %v1211_v23  ;;  %v1570_v31 = vadd.f32 %v354_v27, %v306_v18  ;;  %vm1575_vm14 = vmand %vm275_vm8, %vm281_vm1  ;;  %vm327_vm8 = vcmp.eq.s32.totalorder %v257_v24, %v1358_v7  ;;  %vm279_vm10 = vcmp.lt.s32.totalorder %v258_v36, 200 }
  0x5c   : > { %951 = vst [vmem:[%s1456_s8 + $0x18] sm:$0xff] %v927_v26   ;;  %v1581_v33 = vadd.f32 %v355_v30, %v307_v21  ;;  %vm1585_vm0 = vmand %vm276_vm11, %vm281_vm1  ;;  %v308_v35 = vsel %vm1575_vm14, %v219_v22, 0.0  ;;  %vm280_vm12 = vcmp.lt.s32.totalorder %v259_v39, 200 }
  0x5d   : > { %v309_v37 = vsel %vm1585_vm0, %v220_v29, 0.0  ;;  %vm340_vm3 = vmand %vm1575_vm14, %vm324_vm13  ;;  %vm328_vm14 = vcmp.eq.s32.totalorder %v258_v36, %v1358_v7 }
  0x5e   : > { %v932_v40 = vpack.c.bf16 %v1581_v33, %v1570_v31  ;;  %vm341_vm5 = vmand %vm1585_vm0, %vm325_vm15  ;;  %v356_v41 = vsel %vm340_vm3, 1.0, %v1211_v23  ;;  %vm329_vm0 = vcmp.eq.s32.totalorder %v259_v39, %v1358_v7 }
  0x5f   : > { %v357_v43 = vsel %vm341_vm5, 1.0, %v1211_v23  ;;  %v1606_v44 = vadd.f32 %v356_v41, %v308_v35  ;;  %vm1610_vm7 = vmand %vm277_vm2, %vm281_vm1 }
  0x60   : > { %952 = vst [vmem:[%s1456_s8 + $0x20] sm:$0xff] %v932_v40   ;;  %v373_v46 = vadd.f32 %v357_v43, %v309_v37  ;;  %vm1618_vm9 = vmand %vm278_vm4, %vm281_vm1  ;;  %v310_v49 = vsel %vm1610_vm7, %v221_v38, 0.0 }
  0x61   : > { %v311_v50 = vsel %vm1618_vm9, %v222_v42, 0.0  ;;  %vm342_vm11 = vmand %vm1610_vm7, %vm326_vm6 }
  0x62   : > { %v937_v52 = vpack.c.bf16 %v373_v46, %v1606_v44  ;;  %vm343_vm13 = vmand %vm1618_vm9, %vm327_vm8  ;;  %v358_v53 = vsel %vm342_vm11, 1.0, %v1211_v23 }
  0x63   : > { %v359_v55 = vsel %vm343_vm13, 1.0, %v1211_v23  ;;  %v374_v56 = vadd.f32 %v358_v53, %v310_v49  ;;  %vm296_vm15 = vmand %vm279_vm10, %vm281_vm1 }
  0x64   : > { %953 = vst [vmem:[%s1456_s8 + $0x28] sm:$0xff] %v937_v52   ;;  %v375_v57 = vadd.f32 %v359_v55, %v311_v50  ;;  %vm297_vm2 = vmand %vm280_vm12, %vm281_vm1  ;;  %v312_v58 = vsel %vm296_vm15, %v223_v51, 0.0 }
  0x65   : > { %v313_v59 = vsel %vm297_vm2, %v224_v54, 0.0  ;;  %vm344_vm3 = vmand %vm296_vm15, %vm328_vm14 }
  0x66   : > { %v942_v61 = vpack.c.bf16 %v375_v57, %v374_v56  ;;  %vm345_vm4 = vmand %vm297_vm2, %vm329_vm0  ;;  %v360_v62 = vsel %vm344_vm3, 1.0, %v1211_v23 }
  0x67   : > { %v361_v0 = vsel %vm345_vm4, 1.0, %v1211_v23  ;;  %v376_v2 = vadd.f32 %v360_v62, %v312_v58 }
  0x68   : > { %954 = vst [vmem:[%s1456_s8 + $0x30] sm:$0xff] %v942_v61   ;;  %v377_v4 = vadd.f32 %v361_v0, %v313_v59  ;;  %413 = sbr.rel (%p899_p8) target bundleno = 126 (0x7e), region = 32 }
  0x6a   : > { %v947_v5 = vpack.c.bf16 %v377_v4, %v376_v2 }
  0x6c   : > { %955 = vst [vmem:[%s1456_s8 + $0x38] sm:$0xff] %v947_v5  }
  0x6d   : > { %vm414_vm5 = vcmask 7168   ;;  %v1212_v7 = vmov 0.0  }
  0x6e   : > { %415 = vst.msk [vmem:[%s1367_s30] sm:$0xff] %vm414_vm5, %v1212_v7 }
  0x6f   : > { %416 = vst.msk [vmem:[%s1367_s30 + $0x8] sm:$0xff] %vm414_vm5, %v1212_v7 }
  0x70   : > { %417 = vst.msk [vmem:[%s1367_s30 + $0x10] sm:$0xff] %vm414_vm5, %v1212_v7 }
  0x71   : > { %418 = vst.msk [vmem:[%s1367_s30 + $0x18] sm:$0xff] %vm414_vm5, %v1212_v7 }
  0x72   : > { %419 = vst.msk [vmem:[%s1367_s30 + $0x20] sm:$0xff] %vm414_vm5, %v1212_v7 }
  0x73   : > { %420 = vst.msk [vmem:[%s1367_s30 + $0x28] sm:$0xff] %vm414_vm5, %v1212_v7 }
  0x74   : > { %421 = vst.msk [vmem:[%s1367_s30 + $0x30] sm:$0xff] %vm414_vm5, %v1212_v7 }
  0x75   : > { %422 = vst.msk [vmem:[%s1367_s30 + $0x38] sm:$0xff] %vm414_vm5, %v1212_v7 }
  0x76   : > { %423 = vst.msk [vmem:[%s1367_s30 + $0x40] sm:$0xff] %vm414_vm5, %v1212_v7 }
  0x77   : > { %424 = vst.msk [vmem:[%s1367_s30 + $0x48] sm:$0xff] %vm414_vm5, %v1212_v7 }
  0x78   : > { %425 = vst.msk [vmem:[%s1367_s30 + $0x50] sm:$0xff] %vm414_vm5, %v1212_v7 }
  0x79   : > { %426 = vst.msk [vmem:[%s1367_s30 + $0x58] sm:$0xff] %vm414_vm5, %v1212_v7 }
  0x7a   : > { %427 = vst.msk [vmem:[%s1367_s30 + $0x60] sm:$0xff] %vm414_vm5, %v1212_v7 }
  0x7b   : > { %428 = vst.msk [vmem:[%s1367_s30 + $0x68] sm:$0xff] %vm414_vm5, %v1212_v7 }
  0x7c   : > { %429 = vst.msk [vmem:[%s1367_s30 + $0x70] sm:$0xff] %vm414_vm5, %v1212_v7 }
  0x7d   : > { %430 = vst.msk [vmem:[%s1367_s30 + $0x78] sm:$0xff] %vm414_vm5, %v1212_v7 }
  0x7e PF: > { %447 = vadd.xlane.f32.xlu0 %v1404_v28  ;;  %455 = vadd.xlane.f32.xlu2 %v1488_v60  ;;  %v431_v23 = vld [vmem:[%s1367_s30] sm:$0xff]  ;;  %vm495_vm1 = vcmask 7168   ;;  %v432_v9 = vld [vmem:[%s1367_s30 + $0x8] sm:$0xff]  ;;  %v434_v11 = vld [vmem:[%s1367_s30 + $0x18] sm:$0xff]  ;;  %p900_p0 = scmp.ne.s32.totalorder %s1189_s12, 1 }
  0x7f   : > { %451 = vadd.xlane.f32.xlu1 %v1443_v45  ;;  %v435_v28 = vld [vmem:[%s1367_s30 + $0x20] sm:$0xff]  ;;  %v436_v10 = vld [vmem:[%s1367_s30 + $0x28] sm:$0xff]  ;;  %v437_v18 = vld [vmem:[%s1367_s30 + $0x30] sm:$0xff] }
  0x80   : > { %v439_v19 = vld [vmem:[%s1367_s30 + $0x40] sm:$0xff]  ;;  %v438_v20 = vld [vmem:[%s1367_s30 + $0x38] sm:$0xff]  ;;  %v440_v29 = vld [vmem:[%s1367_s30 + $0x48] sm:$0xff] }
  0x81   : > { %v442_v30 = vld [vmem:[%s1367_s30 + $0x58] sm:$0xff]  ;;  %v443_v38 = vld [vmem:[%s1367_s30 + $0x60] sm:$0xff] }
  0x82   : > { %v444_v40 = vld [vmem:[%s1367_s30 + $0x68] sm:$0xff] }
  0x83   : > { %v445_v39 = vld [vmem:[%s1367_s30 + $0x70] sm:$0xff] }
  0x84   : > { %v446_v47 = vld [vmem:[%s1367_s30 + $0x78] sm:$0xff] }
  0x86   : > { %449 = vadd.xlane.f32.xlu0 %v1416_v32  ;;  %457 = vadd.xlane.f32.xlu2 %v1500_v63  ;;  %v433_v32 = vld [vmem:[%s1367_s30 + $0x10] sm:$0xff] }
  0x87   : > { %453 = vadd.xlane.f32.xlu1 %v1459_v48 }
  0x8e   : > { %459 = vadd.xlane.f32.xlu0 %v1529_v14  ;;  %463 = vadd.xlane.f32.xlu2 %v1570_v31  ;;  %v441_v31 = vld [vmem:[%s1367_s30 + $0x50] sm:$0xff] }
  0x8f   : > { %461 = vadd.xlane.f32.xlu1 %v1540_v16 }
  0x96   : > { %465 = vadd.xlane.f32.xlu0 %v1581_v33  ;;  %469 = vadd.xlane.f32.xlu2 %v373_v46 }
  0x97   : > { %467 = vadd.xlane.f32.xlu1 %v1606_v44 }
  0x9e   : > { %471 = vadd.xlane.f32.xlu0 %v374_v56  ;;  %475 = vadd.xlane.f32.xlu2 %v376_v2 }
  0x9f   : > { %473 = vadd.xlane.f32.xlu1 %v375_v57 }
  0xa6   : > { %477 = vadd.xlane.f32.xlu0 %v377_v4 }
  0xf1   : > { %v448_v45 = vpop.xlane.xlu0 %447  ;;  %v456_v48 = vpop.xlane.xlu2 %455 }
  0xf2   : > { %v479_v60 = vadd.f32 %v448_v45, %v431_v23  ;;  %v483_v63 = vadd.f32 %v456_v48, %v435_v28  ;;  %v452_v6 = vpop.xlane.xlu1 %451 }
  0xf3   : > { %v481_v8 = vadd.f32 %v452_v6, %v433_v32 }
  0xf4   : > { %496 = vst.msk [vmem:[%s1367_s30] sm:$0xff] %vm495_vm1, %v479_v60 }
  0xf5   : > { %500 = vst.msk [vmem:[%s1367_s30 + $0x20] sm:$0xff] %vm495_vm1, %v483_v63 }
  0xf6   : > { %498 = vst.msk [vmem:[%s1367_s30 + $0x10] sm:$0xff] %vm495_vm1, %v481_v8 }
  0xf9   : > { %v450_v12 = vpop.xlane.xlu0 %449  ;;  %v458_v13 = vpop.xlane.xlu2 %457 }
  0xfa   : > { %v480_v14 = vadd.f32 %v450_v12, %v432_v9  ;;  %v484_v15 = vadd.f32 %v458_v13, %v436_v10  ;;  %v454_v16 = vpop.xlane.xlu1 %453 }
  0xfb   : > { %v482_v17 = vadd.f32 %v454_v16, %v434_v11 }
  0xfc   : > { %497 = vst.msk [vmem:[%s1367_s30 + $0x8] sm:$0xff] %vm495_vm1, %v480_v14 }
  0xfd   : > { %501 = vst.msk [vmem:[%s1367_s30 + $0x28] sm:$0xff] %vm495_vm1, %v484_v15 }
  0xfe   : > { %499 = vst.msk [vmem:[%s1367_s30 + $0x18] sm:$0xff] %vm495_vm1, %v482_v17 }
 0x101   : > { %v460_v21 = vpop.xlane.xlu0 %459  ;;  %v464_v22 = vpop.xlane.xlu2 %463 }
 0x102   : > { %v485_v24 = vadd.f32 %v460_v21, %v437_v18  ;;  %v487_v25 = vadd.f32 %v464_v22, %v439_v19  ;;  %v462_v26 = vpop.xlane.xlu1 %461 }
 0x103   : > { %v486_v27 = vadd.f32 %v462_v26, %v438_v20 }
 0x104   : > { %502 = vst.msk [vmem:[%s1367_s30 + $0x30] sm:$0xff] %vm495_vm1, %v485_v24 }
 0x105   : > { %504 = vst.msk [vmem:[%s1367_s30 + $0x40] sm:$0xff] %vm495_vm1, %v487_v25 }
 0x106   : > { %503 = vst.msk [vmem:[%s1367_s30 + $0x38] sm:$0xff] %vm495_vm1, %v486_v27 }
 0x109   : > { %v466_v1 = vpop.xlane.xlu0 %465  ;;  %v470_v33 = vpop.xlane.xlu2 %469 }
 0x10a   : > { %v488_v34 = vadd.f32 %v466_v1, %v440_v29  ;;  %v490_v35 = vadd.f32 %v470_v33, %v442_v30  ;;  %v468_v36 = vpop.xlane.xlu1 %467 }
 0x10b   : > { %v489_v37 = vadd.f32 %v468_v36, %v441_v31 }
 0x10c   : > { %505 = vst.msk [vmem:[%s1367_s30 + $0x48] sm:$0xff] %vm495_vm1, %v488_v34 }
 0x10d   : > { %507 = vst.msk [vmem:[%s1367_s30 + $0x58] sm:$0xff] %vm495_vm1, %v490_v35 }
 0x10e   : > { %506 = vst.msk [vmem:[%s1367_s30 + $0x50] sm:$0xff] %vm495_vm1, %v489_v37 }
 0x111   : > { %v472_v41 = vpop.xlane.xlu0 %471  ;;  %v476_v42 = vpop.xlane.xlu2 %475 }
 0x112   : > { %v491_v43 = vadd.f32 %v472_v41, %v443_v38  ;;  %v493_v44 = vadd.f32 %v476_v42, %v445_v39  ;;  %v474_v3 = vpop.xlane.xlu1 %473 }
 0x113   : > { %v492_v46 = vadd.f32 %v474_v3, %v444_v40 }
 0x114   : > { %508 = vst.msk [vmem:[%s1367_s30 + $0x60] sm:$0xff] %vm495_vm1, %v491_v43 }
 0x115   : > { %510 = vst.msk [vmem:[%s1367_s30 + $0x70] sm:$0xff] %vm495_vm1, %v493_v44 }
 0x116   : > { %509 = vst.msk [vmem:[%s1367_s30 + $0x68] sm:$0xff] %vm495_vm1, %v492_v46 }
 0x118   : > { %515 = sbr.rel (%p900_p0) target bundleno = 338 (0x152), region = 36 }
 0x119   : > { %v478_v49 = vpop.xlane.xlu0 %477 }
 0x11a   : > { %v494_v50 = vadd.f32 %v478_v49, %v446_v47 }
 0x11c   : > { %511 = vst.msk [vmem:[%s1367_s30 + $0x78] sm:$0xff] %vm495_vm1, %v494_v50 }
 0x11d   : > { %v1740_v51 = vld [vmem:[%s1367_s30] sm:$0xff]  ;;  %v1743_v52 = vld [vmem:[%s1367_s30 + $0x8] sm:$0xff]  ;;  %v1746_v53 = vld [vmem:[%s1367_s30 + $0x10] sm:$0xff] }
 0x11e   : > { %1036 = vrsqrt.f32 %v1740_v51  ;;  %v1750_v54 = vld [vmem:[%s1367_s30 + $0x18] sm:$0xff]  ;;  %v1754_v55 = vld [vmem:[%s1367_s30 + $0x20] sm:$0xff]  ;;  %v1758_v56 = vld [vmem:[%s1367_s30 + $0x28] sm:$0xff]  ;;  %vm554_vm6 = vweird.f32 %v1740_v51  ;;  %vm564_vm7 = vweird.f32 %v1743_v52  ;;  %vm574_vm8 = vweird.f32 %v1746_v53 }
 0x11f   : > { %1038 = vrsqrt.f32 %v1743_v52  ;;  %v1762_v57 = vld [vmem:[%s1367_s30 + $0x30] sm:$0xff]  ;;  %v1766_v58 = vld [vmem:[%s1367_s30 + $0x38] sm:$0xff]  ;;  %v1770_v59 = vld [vmem:[%s1367_s30 + $0x40] sm:$0xff]  ;;  %vm532_vm9 = vcmp.gt.f32.partialorder %v1740_v51, 0.0  ;;  %vm584_vm10 = vweird.f32 %v1750_v54  ;;  %vm594_vm11 = vweird.f32 %v1754_v55 }
 0x120   : > { %1040 = vrsqrt.f32 %v1746_v53  ;;  %v1779_v62 = vld [vmem:[%s1367_s30 + $0x48] sm:$0xff]  ;;  %v1790_v4 = vld [vmem:[%s1367_s30 + $0x50] sm:$0xff]  ;;  %vm533_vm13 = vcmp.gt.f32.partialorder %v1743_v52, 0.0  ;;  %vm624_vm3 = vweird.f32 %v1766_v58 }
 0x121   : > { %1042 = vrsqrt.f32 %v1750_v54 }
 0x122   : > { %1044 = vrsqrt.f32 %v1754_v55 }
 0x123   : > { %1046 = vrsqrt.f32 %v1758_v56 }
 0x124   : > { %v1772_v61 = vpop.eup %1036  ;;  %1048 = vrsqrt.f32 %v1762_v57 }
 0x125   : > { %v1781_v0 = vpop.eup %1038  ;;  %v549_v2 = vmul.f32 %v1772_v61, %v1740_v51  ;;  %1050 = vrsqrt.f32 %v1766_v58  ;;  %vm555_vm12 = vweird.f32 %v1772_v61 }
 0x126   : > { %v1792_v5 = vpop.eup %1040  ;;  %v559_v7 = vmul.f32 %v1781_v0, %v1743_v52  ;;  %vm565_vm14 = vweird.f32 %v1781_v0  ;;  %1052 = vrsqrt.f32 %v1770_v59  ;;  %vm1844_vm4 = vmor %vm554_vm6, %vm555_vm12 }
 0x127   : > { %v1801_v23 = vpop.eup %1042  ;;  %v550_v28 = vmul.f32 %v1772_v61, %v549_v2  ;;  %v569_v32 = vmul.f32 %v1792_v5, %v1746_v53  ;;  %vm575_vm2 = vweird.f32 %v1792_v5  ;;  %1054 = vrsqrt.f32 %v1779_v62  ;;  %vm1858_vm6 = vmor %vm564_vm7, %vm565_vm14 }
 0x128   : > { %v1810_v45 = vpop.eup %1044  ;;  %v560_v48 = vmul.f32 %v1781_v0, %v559_v7  ;;  %v579_v60 = vmul.f32 %v1801_v23, %v1750_v54  ;;  %vm585_vm5 = vweird.f32 %v1801_v23  ;;  %1056 = vrsqrt.f32 %v1790_v4  ;;  %vm1870_vm12 = vmor %vm574_vm8, %vm575_vm2 }
 0x129   : > { %v1818_v63 = vpop.eup %1046  ;;  %v551_v6 = vmul.f32 0.5, %v550_v28  ;;  %v570_v8 = vmul.f32 %v1792_v5, %v569_v32  ;;  %v589_v9 = vmul.f32 %v1810_v45, %v1754_v55  ;;  %vm595_vm0 = vweird.f32 %v1810_v45  ;;  %vm1884_vm7 = vmor %vm584_vm10, %vm585_vm5 }
 0x12a   : > { %v1825_v10 = vpop.eup %1048  ;;  %v561_v11 = vmul.f32 0.5, %v560_v48  ;;  %v580_v12 = vmul.f32 %v1801_v23, %v579_v60  ;;  %v599_v13 = vmul.f32 %v1818_v63, %v1758_v56  ;;  %vm1898_vm8 = vmor %vm594_vm11, %vm595_vm0  ;;  %vm2210_vm10 = vweird.f32 %v1758_v56 }
 0x12b   : > { %v1832_v14 = vpop.eup %1050  ;;  %v552_v15 = vsub.f32 1.5, %v551_v6  ;;  %v571_v16 = vmul.f32 0.5, %v570_v8  ;;  %v590_v17 = vmul.f32 %v1810_v45, %v589_v9  ;;  %v609_v18 = vmul.f32 %v1825_v10, %v1762_v57 }
 0x12c   : > { %v1838_v19 = vpop.eup %1052  ;;  %v562_v21 = vsub.f32 1.5, %v561_v11  ;;  %v581_v22 = vmul.f32 0.5, %v580_v12  ;;  %v600_v24 = vmul.f32 %v1818_v63, %v599_v13  ;;  %vm615_vm15 = vweird.f32 %v1825_v10 }
 0x12d   : > { %v1851_v25 = vpop.eup %1054  ;;  %v553_v26 = vmul.f32 %v1772_v61, %v552_v15  ;;  %v572_v29 = vsub.f32 1.5, %v571_v16  ;;  %v591_v30 = vmul.f32 0.5, %v590_v17  ;;  %v610_v31 = vmul.f32 %v1825_v10, %v609_v18  ;;  %v1990_v15 = vld [vmem:[%s1367_s30 + $0x68] sm:$0xff] }
 0x12e   : > { %v1863_v1 = vpop.eup %1056  ;;  %v563_v33 = vmul.f32 %v1781_v0, %v562_v21  ;;  %v582_v35 = vsub.f32 1.5, %v581_v22  ;;  %v601_v36 = vmul.f32 0.5, %v600_v24  ;;  %v619_v37 = vmul.f32 %v1832_v14, %v1766_v58  ;;  %v1999_v21 = vld [vmem:[%s1367_s30 + $0x70] sm:$0xff] }
 0x12f   : > { %v557_v38 = vsel %vm1844_vm4, %v1772_v61, %v553_v26  ;;  %v573_v39 = vmul.f32 %v1792_v5, %v572_v29  ;;  %v592_v41 = vsub.f32 1.5, %v591_v30  ;;  %v611_v42 = vmul.f32 0.5, %v610_v31  ;;  %v2007_v26 = vld [vmem:[%s1367_s30 + $0x78] sm:$0xff] }
 0x130   : > { %v708_v43 = vsel %vm532_vm9, %v557_v38, 0.0  ;;  %v567_v44 = vsel %vm1858_vm6, %v1781_v0, %v563_v33  ;;  %v583_v3 = vmul.f32 %v1801_v23, %v582_v35  ;;  %v602_v47 = vsub.f32 1.5, %v601_v36 }
 0x131   : > { %724 = vst.msk [vmem:[%s1367_s30] sm:$0xff] %vm495_vm1, %v708_v43  ;;  %v709_v49 = vsel %vm533_vm13, %v567_v44, 0.0  ;;  %v577_v50 = vsel %vm1870_vm12, %v1792_v5, %v573_v39  ;;  %v593_v51 = vmul.f32 %v1810_v45, %v592_v41  ;;  %vm2209_vm9 = vweird.f32 %v1818_v63 }
 0x132   : > { %vm1914_vm11 = vmor %vm2210_vm10, %vm2209_vm9  ;;  %v612_v0 = vsub.f32 1.5, %v611_v42  ;;  %725 = vst.msk [vmem:[%s1367_s30 + $0x8] sm:$0xff] %vm495_vm1, %v709_v49  ;;  %vm2213_vm13 = vcmp.gt.f32.partialorder %v1746_v53, 0.0  ;;  %v587_v2 = vsel %vm1884_vm7, %v1801_v23, %v583_v3  ;;  %v603_v5 = vmul.f32 %v1818_v63, %v602_v47 }
 0x133   : > { %v710_v52 = vsel %vm2213_vm13, %v577_v50, 0.0  ;;  %vm2214_vm14 = vweird.f32 %v1762_v57  ;;  %v620_v28 = vmul.f32 %v1832_v14, %v619_v37  ;;  %vm2217_vm2 = vcmp.gt.f32.partialorder %v1750_v54, 0.0 }
 0x134   : > { %vm1930_vm0 = vmor %vm2214_vm14, %vm615_vm15  ;;  %726 = vst.msk [vmem:[%s1367_s30 + $0x10] sm:$0xff] %vm495_vm1, %v710_v52  ;;  %v711_v53 = vsel %vm2217_vm2, %v587_v2, 0.0  ;;  %v597_v23 = vsel %vm1898_vm8, %v1810_v45, %v593_v51  ;;  %v613_v32 = vmul.f32 %v1825_v10, %v612_v0  ;;  %vm625_vm4 = vweird.f32 %v1832_v14  ;;  %v1954_v45 = vld [vmem:[%s1367_s30 + $0x58] sm:$0xff] }
 0x135   : > { %727 = vst.msk [vmem:[%s1367_s30 + $0x18] sm:$0xff] %vm495_vm1, %v711_v53  ;;  %vm2218_vm15 = vcmp.gt.f32.partialorder %v1754_v55, 0.0  ;;  %v607_v54 = vsel %vm1914_vm11, %v1818_v63, %v603_v5  ;;  %v621_v60 = vmul.f32 0.5, %v620_v28  ;;  %v629_v6 = vmul.f32 %v1838_v19, %v1770_v59  ;;  %vm1980_vm7 = vmor %vm624_vm3, %vm625_vm4 }
 0x136   : > { %v712_v48 = vsel %vm2218_vm15, %v597_v23, 0.0  ;;  %vm2219_vm5 = vcmp.gt.f32.partialorder %v1758_v56, 0.0  ;;  %v617_v55 = vsel %vm1930_vm0, %v1825_v10, %v613_v32  ;;  %v639_v9 = vmul.f32 %v1851_v25, %v1779_v62  ;;  %v1972_v56 = vld [vmem:[%s1367_s30 + $0x60] sm:$0xff] }
 0x137   : > { %728 = vst.msk [vmem:[%s1367_s30 + $0x20] sm:$0xff] %vm495_vm1, %v712_v48  ;;  %v713_v8 = vsel %vm2219_vm5, %v607_v54, 0.0  ;;  %vm2220_vm6 = vcmp.gt.f32.partialorder %v1762_v57, 0.0  ;;  %vm539_vm12 = vcmp.gt.f32.partialorder %v1766_v58, 0.0  ;;  %v622_v11 = vsub.f32 1.5, %v621_v60 }
 0x138   : > { %729 = vst.msk [vmem:[%s1367_s30 + $0x28] sm:$0xff] %vm495_vm1, %v713_v8  ;;  %v714_v63 = vsel %vm2220_vm6, %v617_v55, 0.0  ;;  %v630_v12 = vmul.f32 %v1838_v19, %v629_v6  ;;  %vm634_vm8 = vweird.f32 %v1770_v59  ;;  %v640_v57 = vmul.f32 %v1851_v25, %v639_v9 }
 0x139   : > { %730 = vst.msk [vmem:[%s1367_s30 + $0x30] sm:$0xff] %vm495_vm1, %v714_v63  ;;  %v649_v13 = vmul.f32 %v1863_v1, %v1790_v4  ;;  %1058 = vrsqrt.f32 %v1954_v45  ;;  %v623_v16 = vmul.f32 %v1832_v14, %v622_v11  ;;  %vm635_vm3 = vweird.f32 %v1838_v19 }
 0x13a   : > { %v631_v17 = vmul.f32 0.5, %v630_v12  ;;  %vm644_vm9 = vweird.f32 %v1779_v62  ;;  %v641_v18 = vmul.f32 0.5, %v640_v57  ;;  %vm645_vm10 = vweird.f32 %v1851_v25  ;;  %vm2013_vm13 = vmor %vm634_vm8, %vm635_vm3 }
 0x13b   : > { %v650_v20 = vmul.f32 %v1863_v1, %v649_v13  ;;  %1060 = vrsqrt.f32 %v1972_v56  ;;  %v627_v22 = vsel %vm1980_vm7, %v1832_v14, %v623_v16  ;;  %vm654_vm11 = vweird.f32 %v1790_v4  ;;  %vm2026_vm2 = vmor %vm644_vm9, %vm645_vm10 }
 0x13c   : > { %v632_v24 = vsub.f32 1.5, %v631_v17  ;;  %1062 = vrsqrt.f32 %v1990_v15  ;;  %v715_v27 = vsel %vm539_vm12, %v627_v22, 0.0  ;;  %v642_v30 = vsub.f32 1.5, %v641_v18 }
 0x13d   : > { %v651_v31 = vmul.f32 0.5, %v650_v20  ;;  %vm655_vm14 = vweird.f32 %v1863_v1  ;;  %731 = vst.msk [vmem:[%s1367_s30 + $0x38] sm:$0xff] %vm495_vm1, %v715_v27  ;;  %vm540_vm0 = vcmp.gt.f32.partialorder %v1770_v59, 0.0  ;;  %1064 = vrsqrt.f32 %v1999_v21 }
 0x13e   : > { %v633_v14 = vmul.f32 %v1838_v19, %v632_v24  ;;  %vm541_vm4 = vcmp.gt.f32.partialorder %v1779_v62, 0.0  ;;  %v643_v34 = vmul.f32 %v1851_v25, %v642_v30  ;;  %1066 = vrsqrt.f32 %v2007_v26  ;;  %vm2039_vm15 = vmor %vm654_vm11, %vm655_vm14 }
 0x13f   : > { %v1059_v33 = vpop.eup %1058  ;;  %v652_v59 = vsub.f32 1.5, %v651_v31  ;;  %vm542_vm5 = vcmp.gt.f32.partialorder %v1790_v4, 0.0  ;;  %vm543_vm6 = vcmp.gt.f32.partialorder %v1954_v45, 0.0  ;;  %vm664_vm12 = vweird.f32 %v1954_v45 }
 0x140   : > { %v637_v35 = vsel %vm2013_vm13, %v1838_v19, %v633_v14  ;;  %v659_v37 = vmul.f32 %v1059_v33, %v1954_v45  ;;  %v647_v39 = vsel %vm2026_vm2, %v1851_v25, %v643_v34  ;;  %vm665_vm7 = vweird.f32 %v1059_v33 }
 0x141   : > { %v1061_v38 = vpop.eup %1060  ;;  %v716_v62 = vsel %vm540_vm0, %v637_v35, 0.0  ;;  %v653_v40 = vmul.f32 %v1863_v1, %v652_v59  ;;  %v717_v19 = vsel %vm541_vm4, %v647_v39, 0.0  ;;  %vm544_vm8 = vcmp.gt.f32.partialorder %v1972_v56, 0.0  ;;  %vm2068_vm10 = vmor %vm664_vm12, %vm665_vm7 }
 0x142   : > { %v1063_v41 = vpop.eup %1062  ;;  %732 = vst.msk [vmem:[%s1367_s30 + $0x40] sm:$0xff] %vm495_vm1, %v716_v62  ;;  %v660_v42 = vmul.f32 %v1059_v33, %v659_v37  ;;  %v669_v43 = vmul.f32 %v1061_v38, %v1972_v56  ;;  %vm674_vm3 = vweird.f32 %v1972_v56  ;;  %vm675_vm9 = vweird.f32 %v1061_v38 }
 0x143   : > { %733 = vst.msk [vmem:[%s1367_s30 + $0x48] sm:$0xff] %vm495_vm1, %v717_v19  ;;  %v657_v44 = vsel %vm2039_vm15, %v1863_v1, %v653_v40  ;;  %v679_v4 = vmul.f32 %v1063_v41, %v1990_v15  ;;  %v1065_v25 = vpop.eup %1064  ;;  %vm684_vm11 = vweird.f32 %v1990_v15  ;;  %vm685_vm13 = vweird.f32 %v1063_v41  ;;  %vm2076_vm0 = vmor %vm674_vm3, %vm675_vm9 }
 0x144   : > { %v718_v3 = vsel %vm542_vm5, %v657_v44, 0.0  ;;  %v661_v46 = vmul.f32 0.5, %v660_v42  ;;  %v670_v47 = vmul.f32 %v1061_v38, %v669_v43  ;;  %v1067_v49 = vpop.eup %1066  ;;  %v689_v1 = vmul.f32 %v1065_v25, %v1999_v21  ;;  %vm2083_vm15 = vmor %vm684_vm11, %vm685_vm13 }
 0x145   : > { %734 = vst.msk [vmem:[%s1367_s30 + $0x50] sm:$0xff] %vm495_vm1, %v718_v3  ;;  %v680_v50 = vmul.f32 %v1063_v41, %v679_v4  ;;  %v699_v0 = vmul.f32 %v1067_v49, %v2007_v26  ;;  %vm694_vm14 = vweird.f32 %v1999_v21  ;;  %vm695_vm2 = vweird.f32 %v1065_v25 }
 0x146   : > { %v662_v51 = vsub.f32 1.5, %v661_v46  ;;  %v671_v61 = vmul.f32 0.5, %v670_v47  ;;  %v690_v5 = vmul.f32 %v1065_v25, %v689_v1  ;;  %vm704_vm4 = vweird.f32 %v2007_v26  ;;  %vm696_vm7 = vmor %vm694_vm14, %vm695_vm2 }
 0x147   : > { %v681_v2 = vmul.f32 0.5, %v680_v50  ;;  %v700_v53 = vmul.f32 %v1067_v49, %v699_v0  ;;  %vm705_vm5 = vweird.f32 %v1067_v49  ;;  %vm545_vm12 = vcmp.gt.f32.partialorder %v1990_v15, 0.0 }
 0x148   : > { %v663_v7 = vmul.f32 %v1059_v33, %v662_v51  ;;  %v672_v28 = vsub.f32 1.5, %v671_v61  ;;  %v691_v48 = vmul.f32 0.5, %v690_v5  ;;  %vm706_vm3 = vmor %vm704_vm4, %vm705_vm5  ;;  %vm547_vm9 = vcmp.gt.f32.partialorder %v2007_v26, 0.0 }
 0x149   : > { %v682_v32 = vsub.f32 1.5, %v681_v2  ;;  %v701_v8 = vmul.f32 0.5, %v700_v53 }
 0x14a   : > { %v667_v54 = vsel %vm2068_vm10, %v1059_v33, %v663_v7  ;;  %v673_v60 = vmul.f32 %v1061_v38, %v672_v28  ;;  %v692_v63 = vsub.f32 1.5, %v691_v48 }
 0x14b   : > { %v719_v55 = vsel %vm543_vm6, %v667_v54, 0.0  ;;  %v683_v9 = vmul.f32 %v1063_v41, %v682_v32  ;;  %v702_v12 = vsub.f32 1.5, %v701_v8  ;;  %vm546_vm6 = vcmp.gt.f32.partialorder %v1999_v21, 0.0 }
 0x14c   : > { %735 = vst.msk [vmem:[%s1367_s30 + $0x58] sm:$0xff] %vm495_vm1, %v719_v55  ;;  %v677_v11 = vsel %vm2076_vm0, %v1061_v38, %v673_v60  ;;  %v693_v57 = vmul.f32 %v1065_v25, %v692_v63 }
 0x14d   : > { %v720_v45 = vsel %vm544_vm8, %v677_v11, 0.0  ;;  %v687_v10 = vsel %vm2083_vm15, %v1063_v41, %v683_v9  ;;  %v703_v15 = vmul.f32 %v1067_v49, %v702_v12 }
 0x14e   : > { %736 = vst.msk [vmem:[%s1367_s30 + $0x60] sm:$0xff] %vm495_vm1, %v720_v45  ;;  %v721_v13 = vsel %vm545_vm12, %v687_v10, 0.0  ;;  %v697_v56 = vsel %vm696_vm7, %v1065_v25, %v693_v57 }
 0x14f   : > { %737 = vst.msk [vmem:[%s1367_s30 + $0x68] sm:$0xff] %vm495_vm1, %v721_v13  ;;  %v722_v16 = vsel %vm546_vm6, %v697_v56, 0.0  ;;  %v707_v17 = vsel %vm706_vm3, %v1067_v49, %v703_v15 }
 0x150   : > { %738 = vst.msk [vmem:[%s1367_s30 + $0x70] sm:$0xff] %vm495_vm1, %v722_v16  ;;  %v723_v18 = vsel %vm547_vm9, %v707_v17, 0.0 }
 0x151   : > { %739 = vst.msk [vmem:[%s1367_s30 + $0x78] sm:$0xff] %vm495_vm1, %v723_v18 }
 0x152 PF: > { %s908_s6 = sshll.u32 %s1193_s13, 5  ;;  %s764_s18 = sshll.u32 %s1456_s8, 4  ;;  %s765_s18 = int_to_ptr.vmem [resolvable:$true] %s764_s18 }
 0x153   : > { %s761_s22 = sadd.s32 %s1189_s12, %s908_s6  ;;  %s746_s20 = scalar_lea.sflag [#allocation4], %s1338_s15 }
 0x154   : > { %s904_s25 = sshll.u32 %s761_s22, 2  ;;  %s1127_s12 = scalar_lea.hbm %s2159_s2, 256 }
 0x155   : > { %s763_s27 = scalar_lea.hbm %s2159_s2, %s904_s25 }
 0x156   : > { %s766_s3 = sshll.u32 %s763_s27, 4  ;;  %s767_s3 = int_to_ptr.hbm [resolvable:$true] %s766_s3 }
 0x157   : > { %s1121_s17 = sshra.s32 %s767_s3, 4  ;;  %s1122_s17 = int_to_ptr.hbm [resolvable:$true] %s1121_s17 }
 0x158   : > { %s1123_s21 = scalar_lea.hbm %s1122_s17, 64  ;;  %p1128_p4 = scmp.lt.s32.totalorder %s1122_s17, %s2159_s2 }
 0x159   : > { %p1124_p1 = scmp.ne.s32.totalorder %s1122_s17, %s1123_s21  ;;  %p1129_p5 = scmp.lt.s32.totalorder %s1127_s12, %s1123_s21 }
 0x15b   : > { %p1125_p2 = pnand %p1124_p1, %p1295_p9  ;;  %p1130_p6 = por %p1129_p5, %p1128_p4 }
 0x15d   : > { %p1126_p3 = pneg %p1125_p2 }
 0x15f   : > { %p1131_p7 = pnand %p1130_p6, %p1126_p3 }
 0x161   : > { %1134 = shalt.err (!%p1131_p7)
}
 0x162   : > { %s1213_s15 = smov 64   ;;  %s1214_s30 = smov 128  }
 0x163   : > { %s1215_s4 = smov 4  }
 0x164   : > { %957 = dma.vmem_to_hbm [thread:$0]  (%p1295_p9), %s765_s18, 1024, %s767_s3, %s746_s20, %s1213_s15, %s1214_s30, %s1215_s4  }
 0x165 PF: > { %p963_p10 = scmp.ge.s32.totalorder %s1205_s16, 2  ;;  %s789_s8 = sand.u32 1, %s1177_s9  }
 0x166   : > { %s790_s6 = scalar_lea.sflag [#allocation4], %s789_s8 }
 0x167   : > { %p960_p11 = pnand %p963_p10, %p1302_p12 }
 0x169   : > { %p961_p13 = pneg %p960_p11 }
 0x16b   : > { %1172 = dma.done.wait (%p961_p13), %s790_s6, 1024  }
 0x16c   : > { %1174 = vsyncadd (%p961_p13), %s790_s6, 4294966272  ;;  %s19_s16 = sadd.s32 1, %s1205_s16   ;;  %s2235_s13 = sld [smem:[#allocation8_spill]] }
 0x16d   : > { %p16_p8 = scmp.ge.s32.totalorder %s19_s16, 6   ;;  %s2236_s24 = sld [smem:[#allocation9_spill]] }
 0x16e   : > { %s2237_s15 = sld [smem:[#allocation10_spill]]  ;;  %s2238_s9 = smov %s1181_s10 }
 0x16f   : > { %s2239_s10 = smov %s1185_s11  ;;  %s2240_s11 = smov %s1307_s29 }
 0x170   : > { %s2241_s12 = smov %s1197_s14  ;;  %18 = sbr.rel (!%p16_p8) target bundleno = 7 (0x7), region = 89 }
 0x173   : > { %s2242_s14 = smov %s2236_s24 }
 0x175   :  { %796 = vsyncpa [#allocation3], 1 }
 0x176   :  { %798 = vsyncpa [#allocation3 + $0x1], 1 }
 0x177   :  { %799 = vsyncpa [#allocation4], 1 }
 0x178   :  { %801 = vsyncpa [#allocation4 + $0x1], 1 }

</bundles_post_ra>
